<compile_context>
chip_gen: v7x
topology: tpu7x:2x2x1
jax: 0.10.0
libtpu: 0.0.40
codegen_flags: <defaults>
</compile_context>

<pallas_src>
import jax
import jax.numpy as jnp
from jax import lax
from jax.experimental import pallas as pl
from jax.experimental.pallas import tpu as pltpu


def _cross_attn_kernel(x1_ref, x2_ref, w1_ref, w2_ref, mask_ref,
                       o1_ref, o2_ref):
    # x1_ref / x2_ref : (Bb, N, C)  activation block for this batch tile
    # w1_ref / w2_ref : (C, 2C)     fused [K | Q] projection, resident
    #                               (attention scale pre-folded into Q cols)
    # mask_ref        : (C, C)      additive block-diagonal head mask, resident
    # o1_ref / o2_ref : (Bb, N, C)  lane-dense outputs
    mask = mask_ref[...]                      # f32: 0 in-head, -1e30 off-head
    C = mask.shape[0]
    Bb = x1_ref.shape[0]
    w1 = w1_ref[...]                          # hoisted: loaded once per step
    w2 = w2_ref[...]

    def ctx(x, w):
        # Fused projection: one (N,C)x(C,2C) matmul -> [K | Q].
        kq = jnp.dot(x, w, preferred_element_type=jnp.float32)
        k = kq[:, :C]                         # head-major K channels
        q = kq[:, C:]                         # head-major Q channels (pre-scaled)
        # G = K^T Q: contract the token axis, no explicit XLU transpose.
        g = lax.dot_general(k, q,
                            dimension_numbers=(((0,), (0,)), ((), ())),
                            preferred_element_type=jnp.float32)
        g = g + mask                          # block-diagonal head masking
        # Per-head softmax over the K-channel axis (torch softmax(dim=-2)).
        m = jnp.max(g, axis=0, keepdims=True)
        e = jnp.exp(g - m)                    # off-block entries underflow to 0
        s = jnp.sum(e, axis=0, keepdims=True)
        return e * pl.reciprocal(s, approx=True)   # EUP, not VALU

    # Unrolled loop over the (small, compile-time constant) batch block;
    # every iteration is plain 2-D MXU work.
    for i in range(Bb):
        x1 = x1_ref[i]
        x2 = x2_ref[i]
        ctx1 = ctx(x1, w1)                    # (C, C) block-diagonal
        ctx2 = ctx(x2, w2)
        # Cross attention: per-head v @ ctx == x @ block_diag(ctx), so outputs
        # are produced directly in lane-dense (N, C) layout.
        o1_ref[i] = jnp.dot(x1, ctx2.astype(x1.dtype),
                            preferred_element_type=jnp.float32
                            ).astype(o1_ref.dtype)
        o2_ref[i] = jnp.dot(x2, ctx1.astype(x2.dtype),
                            preferred_element_type=jnp.float32
                            ).astype(o2_ref.dtype)


def _pick_batch_block(B):
    # Collapse batch elements into as few grid steps as possible while keeping
    # >= 2 steps when B >= 2 (so dual-TC v7x shards the "parallel" axis across
    # both TensorCores).  Single-TC v5e/v6e simply get fewer, fatter steps.
    target = max(1, B // 2)
    for bb in range(target, 0, -1):
        if B % bb == 0:
            return bb
    return 1


def cross_attention(x1, x2, w_kv1, w_kv2, num_heads, batch_block=None):
    """Pallas implementation of CrossAttention.forward (qkv_bias=False).

    x1, x2       : (B, N, C) activations
    w_kv1, w_kv2 : (2C, C) raw nn.Linear(dim, 2*dim, bias=False).weight
    """
    B, N, C = x1.shape
    H = num_heads
    assert C % H == 0
    d = C // H
    scale = d ** -0.5

    # nn.Linear weight (2C, C): y = x @ W.T has columns ordered
    # [k(head0..H-1) | q(head0..H-1)], each head d channels wide.  Transpose to
    # a single fused (C, 2C) slab and fold the attention scale into the Q half
    # only (constant weights -> one-time wrapper cost).
    def prep_w(w):
        wt = jnp.asarray(w).T.astype(x1.dtype)                     # (C, 2C)
        return jnp.concatenate([wt[:, :C], wt[:, C:] * scale], axis=1)

    w1 = prep_w(w_kv1)
    w2 = prep_w(w_kv2)

    # Additive block-diagonal head mask, built once (hoisted out of the kernel;
    # kept f32 so the -1e30 sentinel and softmax math never drop to bf16).
    head_id = jnp.arange(C, dtype=jnp.int32) // d
    mask = jnp.where(head_id[:, None] == head_id[None, :],
                     jnp.float32(0.0), jnp.float32(-1e30))

    Bb = batch_block if batch_block is not None else _pick_batch_block(B)
    assert B % Bb == 0, f"batch_block {Bb} must divide B={B}"

    o1, o2 = pl.pallas_call(
        _cross_attn_kernel,
        out_shape=[jax.ShapeDtypeStruct((B, N, C), x1.dtype),
                   jax.ShapeDtypeStruct((B, N, C), x2.dtype)],
        grid_spec=pltpu.PrefetchScalarGridSpec(
            num_scalar_prefetch=0,
            grid=(B // Bb,),
            in_specs=[
                pl.BlockSpec((Bb, N, C), lambda b: (b, 0, 0)),   # x1 block
                pl.BlockSpec((Bb, N, C), lambda b: (b, 0, 0)),   # x2 block
                pl.BlockSpec((C, 2 * C), lambda b: (0, 0)),      # w1 (resident)
                pl.BlockSpec((C, 2 * C), lambda b: (0, 0)),      # w2 (resident)
                pl.BlockSpec((C, C), lambda b: (0, 0)),          # head mask (resident)
            ],
            out_specs=[
                pl.BlockSpec((Bb, N, C), lambda b: (b, 0, 0)),
                pl.BlockSpec((Bb, N, C), lambda b: (b, 0, 0)),
            ],
        ),
        compiler_params=pltpu.CompilerParams(
            dimension_semantics=("parallel",),
            vmem_limit_bytes=32 * 1024 * 1024,
        ),
    )(x1, x2, w1, w2, mask)

    return o1, o2


def cross_attention_reference(x1, x2, w_kv1, w_kv2, num_heads):
    """Pure-JAX reference mirroring the PyTorch forward exactly."""
    B, N, C = x1.shape
    H = num_heads
    d = C // H
    scale = d ** -0.5

    def split(x, w):
        kv = x @ w.T                                   # (B, N, 2C)
        kv = kv.reshape(B, N, 2, H, d).transpose(2, 0, 3, 1, 4)
        return kv[0], kv[1]                            # k, q : (B, H, N, d)

    k1, q1 = split(x1, w_kv1)
    k2, q2 = split(x2, w_kv2)
    v1 = x1.reshape(B, N, H, d).transpose(0, 2, 1, 3)
    v2 = x2.reshape(B, N, H, d).transpose(0, 2, 1, 3)

    ctx1 = jax.nn.softmax(jnp.einsum('bhnd,bhne->bhde', k1, q1) * scale, axis=-2)
    ctx2 = jax.nn.softmax(jnp.einsum('bhnd,bhne->bhde', k2, q2) * scale, axis=-2)

    o1 = jnp.einsum('bhnd,bhde->bhne', v1, ctx2).transpose(0, 2, 1, 3).reshape(B, N, C)
    o2 = jnp.einsum('bhnd,bhde->bhne', v2, ctx1).transpose(0, 2, 1, 3).reshape(B, N, C)
    return o1, o2


if __name__ == "__main__":
    B, N, C, H = 2, 16, 64, 8   # head_dim d = 8; qkv_bias=False (module default)

    key = jax.random.PRNGKey(0)
    k1, k2, k3, k4 = jax.random.split(key, 4)
    x1 = jax.random.normal(k1, (B, N, C), dtype=jnp.float32)
    x2 = jax.random.normal(k2, (B, N, C), dtype=jnp.float32)
    # deterministic "nn.Linear(dim, 2*dim, bias=False)" weights, shape (2C, C)
    w_kv1 = jax.random.normal(k3, (2 * C, C), dtype=jnp.float32) * 0.05
    w_kv2 = jax.random.normal(k4, (2 * C, C), dtype=jnp.float32) * 0.05

    out1, out2 = cross_attention(x1, x2, w_kv1, w_kv2, H)
    out1 = jax.block_until_ready(out1)
    out2 = jax.block_until_ready(out2)

    ref1, ref2 = cross_attention_reference(x1, x2, w_kv1, w_kv2, H)
    # Tolerance accounts for the EUP approximate-reciprocal softmax denominator.
    assert jnp.allclose(out1, ref1, rtol=2e-3, atol=2e-3), "x1 output mismatch"
    assert jnp.allclose(out2, ref2, rtol=2e-3, atol=2e-3), "x2 output mismatch"

    print("KERNEL_OK")
</pallas_src>

<mosaic_0001>
module attributes {stable_mosaic.version = 11 : i64} {
  func.func @_cross_attn_kernel(%arg0: i32, %arg1: memref<1x16x64xf32, #tpu.memory_space<vmem>>, %arg2: memref<1x16x64xf32, #tpu.memory_space<vmem>>, %arg3: memref<64x128xf32, #tpu.memory_space<vmem>>, %arg4: memref<64x128xf32, #tpu.memory_space<vmem>>, %arg5: memref<64x64xf32, #tpu.memory_space<vmem>>, %arg6: memref<1x16x64xf32, #tpu.memory_space<vmem>>, %arg7: memref<1x16x64xf32, #tpu.memory_space<vmem>>) attributes {dimension_semantics = [#tpu.dimension_semantics<parallel>], iteration_bounds = array<i64: 2>, scalar_prefetch = 0 : i64, scratch_operands = 0 : i64, tpu.core_type = #tpu.core_type<tc>, window_params = [{transform_indices = @transform_0, window_bounds = array<i64: 1, 16, 64>}, {transform_indices = @transform_1, window_bounds = array<i64: 1, 16, 64>}, {pipeline_mode = #tpu.pipeline_mode<synchronous>, transform_indices = @transform_2, window_bounds = array<i64: 64, 128>}, {pipeline_mode = #tpu.pipeline_mode<synchronous>, transform_indices = @transform_3, window_bounds = array<i64: 64, 128>}, {pipeline_mode = #tpu.pipeline_mode<synchronous>, transform_indices = @transform_4, window_bounds = array<i64: 64, 64>}, {transform_indices = @transform_5, window_bounds = array<i64: 1, 16, 64>}, {transform_indices = @transform_6, window_bounds = array<i64: 1, 16, 64>}]} {
    %c0 = arith.constant 0 : index
    %c0_0 = arith.constant 0 : index
    %0 = vector.load %arg5[%c0, %c0_0] : memref<64x64xf32, #tpu.memory_space<vmem>>, vector<64x64xf32>
    %c0_1 = arith.constant 0 : index
    %c0_2 = arith.constant 0 : index
    %1 = vector.load %arg3[%c0_1, %c0_2] : memref<64x128xf32, #tpu.memory_space<vmem>>, vector<64x128xf32>
    %c0_3 = arith.constant 0 : index
    %c0_4 = arith.constant 0 : index
    %2 = vector.load %arg4[%c0_3, %c0_4] : memref<64x128xf32, #tpu.memory_space<vmem>>, vector<64x128xf32>
    %c0_5 = arith.constant 0 : index
    %c0_6 = arith.constant 0 : index
    %c0_7 = arith.constant 0 : index
    %3 = vector.load %arg1[%c0_5, %c0_6, %c0_7] : memref<1x16x64xf32, #tpu.memory_space<vmem>>, vector<1x16x64xf32>
    %4 = vector.shape_cast %3 : vector<1x16x64xf32> to vector<16x64xf32>
    %c0_8 = arith.constant 0 : index
    %c0_9 = arith.constant 0 : index
    %c0_10 = arith.constant 0 : index
    %5 = vector.load %arg2[%c0_8, %c0_9, %c0_10] : memref<1x16x64xf32, #tpu.memory_space<vmem>>, vector<1x16x64xf32>
    %6 = vector.shape_cast %5 : vector<1x16x64xf32> to vector<16x64xf32>
    %cst = arith.constant dense<0.000000e+00> : vector<16x128xf32>
    %7 = tpu.matmul %4, %1, %cst {dimension_numbers = #tpu.dot_dimension_numbers<[1], [0], [0], [1], [0, 0, 1, 1], [], []>} : vector<16x64xf32>, vector<64x128xf32>, vector<16x128xf32> -> vector<16x128xf32>
    %8 = vector.extract_strided_slice %7 {offsets = [0, 0], sizes = [16, 64], strides = [1, 1]} : vector<16x128xf32> to vector<16x64xf32>
    %9 = vector.extract_strided_slice %7 {offsets = [0, 64], sizes = [16, 64], strides = [1, 1]} : vector<16x128xf32> to vector<16x64xf32>
    %cst_11 = arith.constant dense<0.000000e+00> : vector<64x64xf32>
    %10 = tpu.matmul %8, %9, %cst_11 {dimension_numbers = #tpu.dot_dimension_numbers<[0], [0], [1], [1], [0, 1, 1, 1], [], []>} : vector<16x64xf32>, vector<16x64xf32>, vector<64x64xf32> -> vector<64x64xf32>
    %11 = arith.addf %10, %0 : vector<64x64xf32>
    %cst_12 = arith.constant dense<0xFF800000> : vector<64xf32>
    %12 = vector.multi_reduction <maximumf>, %11, %cst_12 [0] : vector<64x64xf32> to vector<64xf32>
    %13 = vector.shape_cast %12 : vector<64xf32> to vector<1x64xf32>
    %14 = vector.broadcast %13 : vector<1x64xf32> to vector<64x64xf32>
    %15 = arith.subf %11, %14 : vector<64x64xf32>
    %16 = math.exp %15 : vector<64x64xf32>
    %cst_13 = arith.constant dense<0.000000e+00> : vector<64xf32>
    %17 = vector.multi_reduction <add>, %16, %cst_13 [0] : vector<64x64xf32> to vector<64xf32>
    %18 = vector.shape_cast %17 : vector<64xf32> to vector<1x64xf32>
    %19 = tpu.reciprocal %18 {approx = true} : vector<1x64xf32> -> vector<1x64xf32>
    %20 = vector.broadcast %19 : vector<1x64xf32> to vector<64x64xf32>
    %21 = arith.mulf %16, %20 : vector<64x64xf32>
    %cst_14 = arith.constant dense<0.000000e+00> : vector<16x128xf32>
    %22 = tpu.matmul %6, %2, %cst_14 {dimension_numbers = #tpu.dot_dimension_numbers<[1], [0], [0], [1], [0, 0, 1, 1], [], []>} : vector<16x64xf32>, vector<64x128xf32>, vector<16x128xf32> -> vector<16x128xf32>
    %23 = vector.extract_strided_slice %22 {offsets = [0, 0], sizes = [16, 64], strides = [1, 1]} : vector<16x128xf32> to vector<16x64xf32>
    %24 = vector.extract_strided_slice %22 {offsets = [0, 64], sizes = [16, 64], strides = [1, 1]} : vector<16x128xf32> to vector<16x64xf32>
    %cst_15 = arith.constant dense<0.000000e+00> : vector<64x64xf32>
    %25 = tpu.matmul %23, %24, %cst_15 {dimension_numbers = #tpu.dot_dimension_numbers<[0], [0], [1], [1], [0, 1, 1, 1], [], []>} : vector<16x64xf32>, vector<16x64xf32>, vector<64x64xf32> -> vector<64x64xf32>
    %26 = arith.addf %25, %0 : vector<64x64xf32>
    %cst_16 = arith.constant dense<0xFF800000> : vector<64xf32>
    %27 = vector.multi_reduction <maximumf>, %26, %cst_16 [0] : vector<64x64xf32> to vector<64xf32>
    %28 = vector.shape_cast %27 : vector<64xf32> to vector<1x64xf32>
    %29 = vector.broadcast %28 : vector<1x64xf32> to vector<64x64xf32>
    %30 = arith.subf %26, %29 : vector<64x64xf32>
    %31 = math.exp %30 : vector<64x64xf32>
    %cst_17 = arith.constant dense<0.000000e+00> : vector<64xf32>
    %32 = vector.multi_reduction <add>, %31, %cst_17 [0] : vector<64x64xf32> to vector<64xf32>
    %33 = vector.shape_cast %32 : vector<64xf32> to vector<1x64xf32>
    %34 = tpu.reciprocal %33 {approx = true} : vector<1x64xf32> -> vector<1x64xf32>
    %35 = vector.broadcast %34 : vector<1x64xf32> to vector<64x64xf32>
    %36 = arith.mulf %31, %35 : vector<64x64xf32>
    %cst_18 = arith.constant dense<0.000000e+00> : vector<16x64xf32>
    %37 = tpu.matmul %4, %36, %cst_18 {dimension_numbers = #tpu.dot_dimension_numbers<[1], [0], [0], [1], [0, 0, 1, 1], [], []>} : vector<16x64xf32>, vector<64x64xf32>, vector<16x64xf32> -> vector<16x64xf32>
    %c0_19 = arith.constant 0 : index
    %c0_20 = arith.constant 0 : index
    %c0_21 = arith.constant 0 : index
    %38 = vector.load %arg6[%c0_19, %c0_20, %c0_21] : memref<1x16x64xf32, #tpu.memory_space<vmem>>, vector<1x16x64xf32>
    %39 = vector.shape_cast %38 : vector<1x16x64xf32> to vector<16x64xf32>
    %40 = vector.shape_cast %37 : vector<16x64xf32> to vector<1x16x64xf32>
    tpu.vector_store %arg6[%c0_19, %c0_20, %c0_21], %40 {strides = array<i32>} : memref<1x16x64xf32, #tpu.memory_space<vmem>>, vector<1x16x64xf32>,
    %cst_22 = arith.constant dense<0.000000e+00> : vector<16x64xf32>
    %41 = tpu.matmul %6, %21, %cst_22 {dimension_numbers = #tpu.dot_dimension_numbers<[1], [0], [0], [1], [0, 0, 1, 1], [], []>} : vector<16x64xf32>, vector<64x64xf32>, vector<16x64xf32> -> vector<16x64xf32>
    %c0_23 = arith.constant 0 : index
    %c0_24 = arith.constant 0 : index
    %c0_25 = arith.constant 0 : index
    %42 = vector.load %arg7[%c0_23, %c0_24, %c0_25] : memref<1x16x64xf32, #tpu.memory_space<vmem>>, vector<1x16x64xf32>
    %43 = vector.shape_cast %42 : vector<1x16x64xf32> to vector<16x64xf32>
    %44 = vector.shape_cast %41 : vector<16x64xf32> to vector<1x16x64xf32>
    tpu.vector_store %arg7[%c0_23, %c0_24, %c0_25], %44 {strides = array<i32>} : memref<1x16x64xf32, #tpu.memory_space<vmem>>, vector<1x16x64xf32>,
    return
  }
  func.func @transform_0(%arg0: i32) -> (i32, i32, i32) {
    %c0_i32 = arith.constant 0 : i32
    %c0_i32_0 = arith.constant 0 : i32
    %c0_i32_1 = arith.constant 0 : i32
    return %arg0, %c0_i32, %c0_i32_0 : i32, i32, i32
  }
  func.func @transform_1(%arg0: i32) -> (i32, i32, i32) {
    %c0_i32 = arith.constant 0 : i32
    %c0_i32_0 = arith.constant 0 : i32
    %c0_i32_1 = arith.constant 0 : i32
    return %arg0, %c0_i32, %c0_i32_0 : i32, i32, i32
  }
  func.func @transform_2(%arg0: i32) -> (i32, i32) {
    %c0_i32 = arith.constant 0 : i32
    %c0_i32_0 = arith.constant 0 : i32
    %c0_i32_1 = arith.constant 0 : i32
    return %c0_i32, %c0_i32_0 : i32, i32
  }
  func.func @transform_3(%arg0: i32) -> (i32, i32) {
    %c0_i32 = arith.constant 0 : i32
    %c0_i32_0 = arith.constant 0 : i32
    %c0_i32_1 = arith.constant 0 : i32
    return %c0_i32, %c0_i32_0 : i32, i32
  }
  func.func @transform_4(%arg0: i32) -> (i32, i32) {
    %c0_i32 = arith.constant 0 : i32
    %c0_i32_0 = arith.constant 0 : i32
    %c0_i32_1 = arith.constant 0 : i32
    return %c0_i32, %c0_i32_0 : i32, i32
  }
  func.func @transform_5(%arg0: i32) -> (i32, i32, i32) {
    %c0_i32 = arith.constant 0 : i32
    %c0_i32_0 = arith.constant 0 : i32
    %c0_i32_1 = arith.constant 0 : i32
    return %arg0, %c0_i32, %c0_i32_0 : i32, i32, i32
  }
  func.func @transform_6(%arg0: i32) -> (i32, i32, i32) {
    %c0_i32 = arith.constant 0 : i32
    %c0_i32_0 = arith.constant 0 : i32
    %c0_i32_1 = arith.constant 0 : i32
    return %arg0, %c0_i32, %c0_i32_0 : i32, i32, i32
  }
}

</mosaic_0001>

<bundles_post_ra>
// kernel: tpu_custom_call.1
= control target key start
LH: loop header
LB: loop body
LE: loop exit
PB: predicated region body
PF: predicated region fallthrough
CT: control target
= control target key end

     0   :  { %s2605_s0 = inlined_call_operand.hbm [shape: f32[2,16,64], index: 0, kind: input, shape index: {}]   ;;  %s2606_s1 = inlined_call_operand.hbm [shape: f32[2,16,64], index: 1, kind: input, shape index: {}]   ;;  %s2607_s2 = inlined_call_operand.hbm [shape: f32[64,128], index: 2, kind: input, shape index: {}]   ;;  %s2608_s3 = inlined_call_operand.hbm [shape: f32[64,128], index: 3, kind: input, shape index: {}]   ;;  %s2609_s4 = inlined_call_operand.hbm [shape: f32[64,64], index: 4, kind: input, shape index: {}]   ;;  %s2610_s5 = inlined_call_operand.hbm [shape: f32[2,16,64], index: 5, kind: output, shape index: {0}]   ;;  %s2611_s6 = inlined_call_operand.hbm [shape: f32[2,16,64], index: 6, kind: output, shape index: {1}]  }
   0x1   :  { %2619 = sst [smem:[#allocation21_spill]] %s2605_s0 }
   0x2   :  { %2620 = sst [smem:[#allocation22_spill]] %s2607_s2 }
   0x3   :  { %2621 = sst [smem:[#allocation23_spill]] %s2608_s3 }
   0x4   :  { %2622 = sst [smem:[#allocation24_spill]] %s2609_s4 }
   0x5   :  { %12 = vsyncpa [#allocation3], 0 }
   0x6   :  { %14 = vsyncpa [#allocation3 + $0x1], 0 }
   0x7   :  { %15 = vsyncpa [#allocation6], 0 }
   0x8   :  { %17 = vsyncpa [#allocation6 + $0x1], 0 }
   0x9   :  { %18 = vsyncpa [#allocation9], 0 }
   0xa   :  { %19 = vsyncpa [#allocation4], 0 }
   0xb   :  { %21 = vsyncpa [#allocation4 + $0x1], 0 }
   0xc   :  { %22 = vsyncpa [#allocation13], 0 }
   0xd   :  { %24 = vsyncpa [#allocation13 + $0x1], 0  ;;  %s2127_s21 = smov 0   ;;  %s2129_s22 = smov 0  }
   0xe   :  { %s2131_s23 = smov 0   ;;  %s2133_s24 = smov 0  }
   0xf LB: > { %s2148_s25 = sadd.s32 4294967295, %s2078_s24   ;;  %s1389_s26 = sadd.s32 4294967294, %s2078_s24   ;;  %s2078_s24 = sphi %s2133_s24, %s2650_s24   ;;  %s2074_s23 = sphi %s2131_s23, %s2649_s23   ;;  %s2070_s22 = sphi %s2129_s22, %s2648_s22   ;;  %s2066_s21 = sphi %s2127_s21, %s2647_s21  }
  0x10   : > { %p50_p0 = scmp.ne.s32.totalorder %s2070_s22, %s2066_s21  ;;  %p2612_p1 = scmp.eq.s32.totalorder %s2148_s25, 0 }
  0x11   : > { %p169_p3 = scmp.eq.s32.totalorder %s1389_s26, 1  ;;  %p1390_p5 = scmp.ge.s32.totalorder %s2078_s24, 1 }
  0x12   : > { %p2157_p4 = por %p2612_p1, %p50_p0  ;;  %p202_p7 = scmp.lt.s32.totalorder %s2078_s24, 3 }
  0x13   : > { %p2162_p6 = por %p169_p3, %p50_p0  ;;  %s2080_s30 = smov [#allocation7]  }
  0x14   : > { %s2623_s27 = scalar_select %p2157_p4, 1, 0 }
  0x15   : > { %s2624_s28 = scalar_select %p2162_p6, 1, 0 }
  0x16   : > { %p2167_p8 = pnand %p1390_p5, %p202_p7  ;;  %s214_s7 = sshll.u32 %s2080_s30, 4  ;;  %s2171_s7 = int_to_ptr.vmem [resolvable:$true] %s214_s7 }
  0x17   : > { %s2081_s9 = smov [#allocation8]   ;;  %s2082_s11 = smov [#allocation10]  }
  0x18   : > { %s2625_s29 = scalar_select %p2167_p8, 1, 0 }
  0x19   : > { %p1705_p9 = pneg %p2167_p8  ;;  %s227_s10 = sshll.u32 %s2081_s9, 4  ;;  %s2182_s10 = int_to_ptr.vmem [resolvable:$true] %s227_s10 }
  0x1a   : > { %s2184_s12 = sshll.u32 %s2082_s11, 4  ;;  %s2627_s2 = sld [smem:[#allocation22_spill]]  ;;  %s241_s12 = int_to_ptr.vmem [resolvable:$true] %s2184_s12 }
  0x1b   : > { %p2178_p11 = pnand %p1705_p9, %p2612_p1 }
  0x1d   : > { %p2194_p13 = pneg %p2178_p11 }
  0x20   : > { %s1824_s15 = scalar_lea.hbm %s2627_s2, 1024 }
  0x21   : > { %p1825_p12 = scmp.ne.s32.totalorder %s2627_s2, %s1824_s15  ;;  %p1831_p5 = scmp.lt.u32.totalorder %s1824_s15, %s2627_s2 }
  0x23   : > { %p1827_p0 = pnand %p2194_p13, %p1825_p12 }
  0x25   : > { %p1828_p3 = pneg %p1827_p0 }
  0x27   : > { %p1833_p7 = pnand %p1831_p5, %p1828_p3 }
  0x29   : > { %1836 = shalt.err (!%p1833_p7)
}
  0x2a   : > { %s1837_s26 = scalar_lea.vmem %s2171_s7, 1024  ;;  %p1845_p2 = scmp.lt.s32.totalorder %s2171_s7, %s2171_s7 }
  0x2b   : > { %p1838_p9 = scmp.ne.s32.totalorder %s2171_s7, %s1837_s26  ;;  %p1846_p6 = scmp.lt.s32.totalorder %s1837_s26, %s1837_s26 }
  0x2d   : > { %p1840_p10 = pnand %p1838_p9, %p2194_p13  ;;  %p1847_p12 = por %p1846_p6, %p1845_p2 }
  0x2f   : > { %p1841_p1 = pneg %p1840_p10 }
  0x31   : > { %p1848_p0 = pnand %p1847_p12, %p1841_p1 }
  0x33   : > { %1851 = shalt.err (!%p1848_p0)
}
  0x34   : > { %s2615_s30 = smov 128   ;;  %s2617_s9 = smov 8  }
  0x35   : > { %1708 = dma.hbm_to_vmem [thread:$0]  (!%p2178_p11), %s2627_s2, 1024, %s2171_s7, [#allocation6], %s2615_s30, %s2615_s30, %s2617_s9  }
  0x36   : > { %s2629_s3 = sld [smem:[#allocation23_spill]] }
  0x3c   : > { %s1852_s16 = scalar_lea.hbm %s2629_s3, 1024 }
  0x3d   : > { %p1853_p1 = scmp.ne.s32.totalorder %s2629_s3, %s1852_s16  ;;  %p1859_p10 = scmp.lt.u32.totalorder %s1852_s16, %s2629_s3 }
  0x3f   : > { %p1855_p2 = pnand %p1853_p1, %p2194_p13 }
  0x41   : > { %p1856_p6 = pneg %p1855_p2 }
  0x43   : > { %p1861_p3 = pnand %p1859_p10, %p1856_p6 }
  0x45   : > { %1864 = shalt.err (!%p1861_p3)
}
  0x46   : > { %s1865_s7 = scalar_lea.vmem %s2182_s10, 1024  ;;  %p1873_p12 = scmp.lt.s32.totalorder %s2182_s10, %s2182_s10 }
  0x47   : > { %p1866_p5 = scmp.ne.s32.totalorder %s2182_s10, %s1865_s7  ;;  %p1874_p0 = scmp.lt.s32.totalorder %s1865_s7, %s1865_s7 }
  0x49   : > { %p1868_p7 = pnand %p1866_p5, %p2194_p13  ;;  %p1875_p1 = por %p1874_p0, %p1873_p12 }
  0x4b   : > { %p1869_p9 = pneg %p1868_p7 }
  0x4d   : > { %p1876_p2 = pnand %p1875_p1, %p1869_p9 }
  0x4f   : > { %1879 = shalt.err (!%p1876_p2)
}
  0x50   : > { %1711 = dma.hbm_to_vmem [thread:$0]  (!%p2178_p11), %s2629_s3, 1024, %s2182_s10, [#allocation9], %s2615_s30, %s2615_s30, %s2617_s9  }
  0x51   : > { %s2630_s4 = sld [smem:[#allocation24_spill]] }
  0x57   : > { %s1880_s16 = scalar_lea.hbm %s2630_s4, 1024 }
  0x58   : > { %p1881_p6 = scmp.ne.s32.totalorder %s2630_s4, %s1880_s16  ;;  %p1887_p5 = scmp.lt.u32.totalorder %s1880_s16, %s2630_s4 }
  0x5a   : > { %p1883_p10 = pnand %p1881_p6, %p2194_p13 }
  0x5c   : > { %p1884_p3 = pneg %p1883_p10 }
  0x5e   : > { %p1889_p7 = pnand %p1887_p5, %p1884_p3 }
  0x60   : > { %1892 = shalt.err (!%p1889_p7)
}
  0x61   : > { %s1893_s7 = scalar_lea.vmem %s241_s12, 1024  ;;  %p1901_p1 = scmp.lt.s32.totalorder %s241_s12, %s241_s12 }
  0x62   : > { %p1894_p9 = scmp.ne.s32.totalorder %s241_s12, %s1893_s7  ;;  %p1902_p2 = scmp.lt.s32.totalorder %s1893_s7, %s1893_s7 }
  0x64   : > { %p1896_p12 = pnand %p1894_p9, %p2194_p13  ;;  %p1903_p4 = por %p1902_p2, %p1901_p1 }
  0x66   : > { %p1897_p0 = pneg %p1896_p12 }
  0x68   : > { %p1904_p8 = pnand %p1903_p4, %p1897_p0 }
  0x6a   : > { %1907 = shalt.err (!%p1904_p8)
}
  0x6b   : > { %1714 = dma.hbm_to_vmem [thread:$0]  (!%p2178_p11), %s2630_s4, 1024, %s241_s12, [#allocation9], %s2615_s30, %s2615_s30, %s2617_s9  }
  0x6c   : > { %s2267_s18 = sadd.s32 1, %s2078_s24   ;;  %s37_s13 = sadd.s32 1, %s2074_s23 }
  0x6d   : > { %s34_s8 = ssub.s32 %s2078_s24, %s2267_s18  ;;  %p44_p8 = scmp.ne.s32.totalorder %s2074_s23, %s2070_s22 }
  0x6e   : > { %p35_p4 = scmp.eq.s32.totalorder %s34_s8, 0  ;;  %p45_p13 = scmp.eq.s32.totalorder %s2078_s24, 0 }
  0x6f   : > { %p1732_p6 = scmp.lt.s32.totalorder %s2078_s24, 2  ;;  %p2632_p3 = scmp.eq.s32.totalorder %s2148_s25, 1 }
  0x70   : > { %s2277_s14 = scalar_select %p35_p4, %s2074_s23, %s37_s13  }
  0x71   : > { %p46_p10 = por %p45_p13, %p44_p8  ;;  %p2281_p5 = por %p2632_p3, %p44_p8 }
  0x72   : > { %2631 = sst [smem:[#allocation20_spill]] %s2277_s14  ;;  %s254_s16 = sand.u32 1, %s2074_s23  }
  0x73   : > { %s1441_s17 = sshll.u32 %s2078_s24, 8  ;;  %s2287_s12 = sshll.u32 %s254_s16, 4 }
  0x74   : > { %s2634_s0 = sld [smem:[#allocation21_spill]]  ;;  %s258_s7 = scalar_lea.vmem [#allocation2], %s2287_s12 }
  0x75   : > { %s265_s10 = sshll.u32 %s258_s7, 4  ;;  %p2295_p11 = pnand %p1732_p6, %p46_p10  ;;  %s2299_s10 = int_to_ptr.vmem [resolvable:$true] %s265_s10 }
  0x76   : > { %s2304_s19 = scalar_lea.hbm %s2606_s1, %s1441_s17  ;;  %s2306_s20 = scalar_lea.sflag [#allocation3], %s254_s16 }
  0x77   : > { %p1910_p9 = pneg %p2295_p11 }
  0x7a   : > { %s2292_s26 = scalar_lea.hbm %s2634_s0, %s1441_s17  ;;  %s1913_s2 = scalar_lea.hbm %s2634_s0, 512 }
  0x7b   : > { %s1908_s30 = scalar_lea.hbm %s2292_s26, 256  ;;  %p1914_p1 = scmp.lt.u32.totalorder %s2292_s26, %s2634_s0 }
  0x7c   : > { %p1909_p7 = scmp.ne.s32.totalorder %s2292_s26, %s1908_s30  ;;  %p1915_p2 = scmp.lt.u32.totalorder %s1913_s2, %s1908_s30 }
  0x7d   : > { %p1917_p8 = scmp.lt.u32.totalorder %s1908_s30, %s2292_s26 }
  0x7e   : > { %p1911_p12 = pnand %p1910_p9, %p1909_p7  ;;  %p1916_p4 = por %p1915_p2, %p1914_p1 }
  0x80   : > { %p1912_p0 = pneg %p1911_p12  ;;  %p1918_p13 = por %p1917_p8, %p1916_p4 }
  0x82   : > { %p1919_p6 = pnand %p1918_p13, %p1912_p0 }
  0x84   : > { %1922 = shalt.err (!%p1919_p6)
}
  0x85   : > { %s1923_s16 = scalar_lea.vmem %s2299_s10, 256  ;;  %s2085_s9 = smov [#allocation2]  }
  0x86   : > { %p1924_p10 = scmp.ne.s32.totalorder %s2299_s10, %s1923_s16  ;;  %s1928_s17 = sshll.u32 %s2085_s9, 4  ;;  %s1929_s17 = int_to_ptr.vmem [resolvable:$false] %s1928_s17 }
  0x87   : > { %s1930_s3 = scalar_lea.vmem %s1929_s17, 512  ;;  %p1931_p12 = scmp.lt.s32.totalorder %s2299_s10, %s1929_s17 }
  0x88   : > { %p1926_p3 = pnand %p1924_p10, %p1910_p9  ;;  %p1932_p1 = scmp.lt.s32.totalorder %s1930_s3, %s1923_s16 }
  0x8a   : > { %p1927_p7 = pneg %p1926_p3  ;;  %p1933_p2 = por %p1932_p1, %p1931_p12 }
  0x8c   : > { %p1934_p4 = pnand %p1933_p2, %p1927_p7 }
  0x8e   : > { %1937 = shalt.err (!%p1934_p4)
}
  0x8f   : > { %s2636_s2 = smov 8   ;;  %s2637_s4 = smov 128  }
  0x90   : > { %1718 = dma.hbm_to_vmem [thread:$0]  (!%p2295_p11), %s2292_s26, 256, %s2299_s10, %s2306_s20, %s2637_s4, %s2637_s4, %s2636_s2  }
  0x91   : > { %s279_s30 = scalar_lea.vmem [#allocation5], %s2287_s12  ;;  %s275_s13 = sand.u32 1, %s2078_s24  }
  0x92   : > { %s286_s8 = sshll.u32 %s279_s30, 4  ;;  %s2341_s7 = scalar_lea.sflag [#allocation6], %s275_s13  ;;  %s2339_s8 = int_to_ptr.vmem [resolvable:$true] %s286_s8 }
  0x93   : > { %s1938_s16 = scalar_lea.hbm %s2304_s19, 256  ;;  %s1943_s3 = scalar_lea.hbm %s2606_s1, 512 }
  0x94   : > { %p1939_p0 = scmp.ne.s32.totalorder %s2304_s19, %s1938_s16  ;;  %p1944_p6 = scmp.lt.u32.totalorder %s2304_s19, %s2606_s1 }
  0x95   : > { %p1945_p10 = scmp.lt.u32.totalorder %s1943_s3, %s1938_s16  ;;  %p1947_p7 = scmp.lt.u32.totalorder %s1938_s16, %s2304_s19 }
  0x96   : > { %p1941_p8 = pnand %p1939_p0, %p1910_p9 }
  0x97   : > { %p1946_p3 = por %p1945_p10, %p1944_p6 }
  0x98   : > { %p1942_p13 = pneg %p1941_p8 }
  0x99   : > { %p1948_p12 = por %p1947_p7, %p1946_p3 }
  0x9b   : > { %p1949_p1 = pnand %p1948_p12, %p1942_p13 }
  0x9d   : > { %1952 = shalt.err (!%p1949_p1)
}
  0x9e   : > { %s1953_s12 = scalar_lea.vmem %s2339_s8, 256  ;;  %s2086_s26 = smov [#allocation5]  }
  0x9f   : > { %p1954_p2 = scmp.ne.s32.totalorder %s2339_s8, %s1953_s12  ;;  %s1958_s10 = sshll.u32 %s2086_s26, 4  ;;  %s1959_s10 = int_to_ptr.vmem [resolvable:$false] %s1958_s10 }
  0xa0   : > { %s1960_s0 = scalar_lea.vmem %s1959_s10, 512  ;;  %p1961_p8 = scmp.lt.s32.totalorder %s2339_s8, %s1959_s10 }
  0xa1   : > { %p1956_p4 = pnand %p1954_p2, %p1910_p9  ;;  %p1962_p6 = scmp.lt.s32.totalorder %s1960_s0, %s1953_s12 }
  0xa3   : > { %p1957_p0 = pneg %p1956_p4  ;;  %p1963_p10 = por %p1962_p6, %p1961_p8 }
  0xa5   : > { %p1964_p3 = pnand %p1963_p10, %p1957_p0 }
  0xa7   : > { %1967 = shalt.err (!%p1964_p3)
}
  0xa8   : > { %1721 = dma.hbm_to_vmem [thread:$0]  (!%p2295_p11), %s2304_s19, 256, %s2339_s8, %s2341_s7, %s2637_s4, %s2637_s4, %s2636_s2  }
  0xa9   : > { %p2638_p9 = scmp.ne.s32.totalorder %s2625_s29, 0 }
  0xaa   : > { %s2373_s14 = sand.u32 (!%p2638_p9), 1, %s2070_s22   ;;  %p2639_p13 = scmp.ne.s32.totalorder (!%p2638_p9), %s2623_s27, 0 }
  0xab   : > { %298 = sbr.rel (%p2638_p9) target bundleno = 1562 (0x61a), region = 40  ;;  %s2376_s20 = sshll.u32 (!%p2638_p9), %s2373_s14, 4 }
  0xac   : > { %s301_s11 = scalar_lea.sflag (!%p2638_p9), [#allocation3], %s2373_s14  ;;  %s304_s30 = scalar_lea.vmem (!%p2638_p9), [#allocation2], %s2376_s20 }
  0xb2   : > { %2041 = dma.done.wait (%p2639_p13), %s301_s11, 256  }
  0xb3   : > { %2043 = vsyncadd (%p2639_p13), %s301_s11, 4294967040  ;;  %s309_s29 = sand.u32 1, %s2148_s25   ;;  %s313_s2 = scalar_lea.vmem [#allocation5], %s2376_s20 }
  0xb4   : > { %s310_s19 = scalar_lea.sflag [#allocation6], %s309_s29 }
  0xb5   : > { %2045 = dma.done.wait (%p2639_p13), %s310_s19, 256  }
  0xb6   : > { %2047 = vsyncadd (%p2639_p13), %s310_s19, 4294967040  ;;  %p2640_p11 = scmp.eq.s32.totalorder %s2148_s25, 0 }
  0xb8   : > { %2049 = dma.done.wait (%p2640_p11), [#allocation6], 1024   ;;  %p2641_p7 = pmov %p2640_p11 }
  0xba   : > { %2051 = vsyncadd (%p2641_p7), [#allocation6], 4294966272  ;;  %p2642_p12 = pmov %p2641_p7 }
  0xbb   : > { %p2643_p1 = pmov %p2641_p7 }
  0xbc   : > { %2053 = dma.done.wait (%p2642_p12), [#allocation9], 2048  }
  0xbd   : > { %2055 = vsyncadd (%p2643_p1), [#allocation9], 4294965248  ;;  %v372_v0 = vld [vmem:[#allocation7] sm:$0xff]  ;;  %v373_v1 = vld [vmem:[#allocation7 + $0x8] sm:$0xff]  ;;  %vm392_vm0 = vcmask 523264   ;;  %s2087_s27 = smov 64  }
  0xbe   : > { %v374_v2 = vld [vmem:[#allocation7 + $0x10] sm:$0xff]  ;;  %v1613_v3 = vpack.c.bf16 %v373_v1, %v372_v0  ;;  %v375_v4 = vld [vmem:[#allocation7 + $0x18] sm:$0xff]  ;;  %v376_v6 = vld [vmem:[#allocation7 + $0x20] sm:$0xff]  ;;  %vm514_vm1 = vcmask 130048   ;;  %s363_s4 = scalar_lea.vmem [#allocation12], %s2376_s20  ;;  %s1443_s13 = sshll.u32 %s2148_s25, 8 }
  0xbf   : > { %v1617_v5 = vpack.c.bf16 %v375_v4, %v374_v2  ;;  %v377_v7 = vld [vmem:[#allocation7 + $0x28] sm:$0xff]  ;;  %v2400_v8 = vld [vmem:[%s304_s30] sm:$0xff]  ;;  %v379_v11 = vld [vmem:[#allocation7 + $0x38] sm:$0xff]  ;;  %s1233_s8 = sshll.u32 %s363_s4, 4  ;;  %s2519_s9 = scalar_lea.hbm %s2611_s6, %s1443_s13  ;;  %s2510_s8 = int_to_ptr.vmem [resolvable:$true] %s1233_s8 }
  0xc0   : > { %1614 = vmatprep.subr.bf16.mxu0 %v1613_v3  ;;  %1521 = vmatprep.mubr.msk.f32.mxu0 %vm392_vm0, %v2400_v8  ;;  %v1621_v9 = vpack.c.bf16 %v377_v7, %v376_v6  ;;  %v378_v10 = vld [vmem:[#allocation7 + $0x30] sm:$0xff]  ;;  %v2406_v13 = vld [vmem:[%s304_s30 + $0x8] sm:$0xff]  ;;  %v380_v18 = vld [vmem:[#allocation8] sm:$0xff]  ;;  %s1204_s17 = scalar_lea.sflag [#allocation13], %s2373_s14  ;;  %s1968_s3 = scalar_lea.vmem %s2510_s8, 256 }
  0xc1   : > { %1616 = vmatpush3.bf16.msra.mxu0 %v1613_v3  ;;  %v1625_v12 = vpack.c.bf16 %v379_v11, %v378_v10  ;;  %v381_v19 = vld [vmem:[#allocation8 + $0x8] sm:$0xff]  ;;  %v382_v25 = vld [vmem:[#allocation8 + $0x10] sm:$0xff]  ;;  %v383_v26 = vld [vmem:[#allocation8 + $0x18] sm:$0xff]  ;;  %p1969_p2 = scmp.ne.s32.totalorder %s2510_s8, %s1968_s3  ;;  %s2088_s12 = smov [#allocation12]  }
  0xc2   : > { %1618 = vmatprep.subr.bf16.mxu0 %v1617_v5  ;;  %v1633_v23 = vpack.c.bf16 %v381_v19, %v380_v18  ;;  %v1637_v27 = vpack.c.bf16 %v383_v26, %v382_v25  ;;  %v384_v29 = vld [vmem:[#allocation8 + $0x20] sm:$0xff]  ;;  %v385_v30 = vld [vmem:[#allocation8 + $0x28] sm:$0xff]  ;;  %v386_v33 = vld [vmem:[#allocation8 + $0x30] sm:$0xff]  ;;  %s1972_s26 = sshll.u32 %s2088_s12, 4  ;;  %s1973_s26 = int_to_ptr.vmem [resolvable:$false] %s1972_s26 }
  0xc3   : > { %v1641_v31 = vpack.c.bf16 %v385_v30, %v384_v29  ;;  %v387_v34 = vld [vmem:[#allocation8 + $0x38] sm:$0xff]  ;;  %v390_v40 = vld [vmem:[%s313_s2] sm:$0xff]  ;;  %v2429_v47 = vld [vmem:[#allocation10 + $0x8] sm:$0xff]  ;;  %p1970_p4 = pnand %p1969_p2, %p2281_p5  ;;  %s1974_s10 = scalar_lea.vmem %s1973_s26, 512 }
  0xc4   : > { %v1645_v35 = vpack.c.bf16 %v387_v34, %v386_v33  ;;  %v2424_v42 = vld [vmem:[%s313_s2 + $0x8] sm:$0xff]  ;;  %v2431_v48 = vld [vmem:[#allocation10] sm:$0xff]  ;;  %v2447_v63 = vld [vmem:[#allocation10 + $0x10] sm:$0xff]  ;;  %p1975_p8 = scmp.lt.s32.totalorder %s2510_s8, %s1973_s26  ;;  %p1976_p6 = scmp.lt.s32.totalorder %s1974_s10, %s1968_s3 }
  0xc5   : > { %1620 = vmatpush3.bf16.msra.mxu0 %v1617_v5  ;;  %v2433_v49 = vld [vmem:[#allocation10 + $0x28] sm:$0xff]  ;;  %v2436_v51 = vld [vmem:[#allocation10 + $0x20] sm:$0xff]  ;;  %v2444_v60 = vld [vmem:[#allocation10 + $0x18] sm:$0xff]  ;;  %p1971_p0 = pneg %p1970_p4 }
  0xc6   : > { %1622 = vmatprep.subr.bf16.mxu0 %v1621_v9  ;;  %v2449_v1 = vld [vmem:[#allocation10 + $0x38] sm:$0xff]  ;;  %v2452_v4 = vld [vmem:[#allocation10 + $0x30] sm:$0xff]  ;;  %p1977_p10 = por %p1976_p6, %p1975_p8 }
  0xc8   : > { %p1978_p3 = pnand %p1977_p10, %p1971_p0 }
  0xc9   : > { %1624 = vmatpush3.bf16.msra.mxu0 %v1621_v9 }
  0xca   : > { %1626 = vmatprep.subr.bf16.mxu0 %v1625_v12 }
  0xcd   : > { %1628 = vmatpush3.bf16.msra.mxu0 %v1625_v12 }
  0xd0   : > { %1522 = vmatmul.mubr.msk.f32.vlgmr.msra.gmra.mrb[0].mxu0 %vm392_vm0, %v2406_v13 }
 0x1a3   : > { %v1523_v14 = vpop.f32.mrb[0].mxu0 }
 0x1a4   : > { %v465_v15 = vpop.f32.mrb[1].mxu0 }
 0x1a5   : > { %v1778_v16 = vpack.i.bf16 %v1523_v14, %v465_v15 }
 0x1a7   : > { %1779 = vrot.lane.b32.xlu0 %v1778_v16, %s2087_s27 }
 0x1c5   : > { %474 = vxpose.xlu0.b32.start [1/2] (short) (narrow) %v465_v15, 64 }
 0x1c9   : > { %475 = vxpose.xlu0.b32.end [2/2] (short) (narrow) %v1523_v14, 64 }
 0x219   : > { %v1780_v17 = vpop.permute.xlu0 %1779 }
 0x21a   : > { %v1782_v20 = vunpack.i.h.bf16 %v1780_v17  ;;  %v1781_v21 = vunpack.i.l.bf16 %v1780_v17 }
 0x21c   : > { %v1629_v22 = vpack.c.bf16 %v1782_v20, %v1781_v21 }
 0x21e   : > { %1630 = vmatprep.subr.bf16.mxu1 %v1629_v22 }
 0x21f   : > { %1632 = vmatpush3.bf16.msra.mxu1 %v1629_v22 }
 0x220   : > { %1634 = vmatprep.subr.bf16.mxu1 %v1633_v23 }
 0x245   : > { %v490_v24 = vpop.trf.xlu0 }
 0x246   : > { %1528 = vmatprep.mubr.msk.f32.mxu1 %vm514_vm1, %v490_v24 }
 0x249   : > { %v491_v28 = vpop.trf.xlu0 }
 0x24a   : > { %1529 = vmatmul.mubr.msk.f32.vlgmr.msra.gmra.mrb[0].mxu1 %vm514_vm1, %v491_v28 }
 0x24b   : > { %1636 = vmatpush3.bf16.msra.mxu1 %v1633_v23 }
 0x24c   : > { %1638 = vmatprep.subr.bf16.mxu1 %v1637_v27 }
 0x24d   : > { %v492_v32 = vpop.trf.xlu0 }
 0x24e   : > { %1531 = vmatprep.mubr.msk.f32.mxu1 %vm514_vm1, %v492_v32 }
 0x24f   : > { %1640 = vmatpush3.bf16.msra.mxu1 %v1637_v27 }
 0x250   : > { %1642 = vmatprep.subr.bf16.mxu1 %v1641_v31 }
 0x251   : > { %v493_v36 = vpop.trf.xlu0 }
 0x252   : > { %1532 = vmatmul.mubr.msk.f32.gmra.mrb[2].mxu1 %vm514_vm1, %v493_v36 }
 0x253   : > { %1644 = vmatpush3.bf16.msra.mxu1 %v1641_v31 }
 0x254   : > { %1646 = vmatprep.subr.bf16.mxu1 %v1645_v35 }
 0x255   : > { %v494_v37 = vpop.trf.xlu0 }
 0x256   : > { %1534 = vmatprep.mubr.msk.f32.mxu1 %vm514_vm1, %v494_v37 }
 0x257   : > { %1648 = vmatpush3.bf16.msra.mxu1 %v1645_v35 }
 0x259   : > { %v495_v38 = vpop.trf.xlu0 }
 0x25a   : > { %1535 = vmatmul.mubr.msk.f32.gmra.mrb[4].mxu1 %vm514_vm1, %v495_v38 }
 0x25d   : > { %v496_v39 = vpop.trf.xlu0 }
 0x25e   : > { %1537 = vmatprep.mubr.msk.f32.mxu1 %vm514_vm1, %v496_v39 }
 0x261   : > { %v497_v41 = vpop.trf.xlu0 }
 0x262   : > { %1538 = vmatmul.mubr.msk.f32.gmra.mrb[6].mxu1 %vm514_vm1, %v497_v41 }
 0x263   : > { %1556 = vmatprep.mubr.msk.f32.mxu1 %vm392_vm0, %v390_v40 }
 0x266   : > { %1557 = vmatmul.mubr.msk.f32.vlgmr.msra.gmra.mrb[8].mxu1 %vm392_vm0, %v2424_v42 }
 0x267   : > { %1610 = vmatprep.mubr.msk.f32.mxu1 %vm392_vm0, %v390_v40 }
 0x31d   : > { %v1530_v43 = vpop.f32.mrb[0].mxu1 }
 0x31e   : > { %v605_v44 = vpop.f32.mrb[1].mxu1  ;;  %v611_v50 = vadd.f32 %v1530_v43, %v2429_v47 }
 0x31f   : > { %v606_v52 = vadd.f32 %v605_v44, %v2431_v48 }
 0x320   : > { %v645_v57 = vsel %vm392_vm0, %v611_v50, -inf }
 0x321   : > { %v644_v59 = vsel %vm392_vm0, %v606_v52, -inf }
 0x325   : > { %v1533_v45 = vpop.f32.mrb[2].mxu1 }
 0x326   : > { %v615_v46 = vpop.f32.mrb[3].mxu1  ;;  %v621_v2 = vadd.f32 %v1533_v45, %v2444_v60 }
 0x327   : > { %v616_v5 = vadd.f32 %v615_v46, %v2447_v63 }
 0x328   : > { %v647_v11 = vsel %vm392_vm0, %v621_v2, -inf }
 0x329   : > { %v646_v14 = vsel %vm392_vm0, %v616_v5, -inf }
 0x32d   : > { %v1536_v53 = vpop.f32.mrb[4].mxu1 }
 0x32e   : > { %v631_v54 = vadd.f32 %v1536_v53, %v2433_v49  ;;  %v625_v55 = vpop.f32.mrb[5].mxu1 }
 0x32f   : > { %v626_v56 = vadd.f32 %v625_v55, %v2436_v51 }
 0x330   : > { %v650_v58 = vsel %vm392_vm0, %v631_v54, -inf }
 0x331   : > { %v651_v61 = vmax.f32 %v645_v57, %v650_v58  ;;  %v648_v62 = vsel %vm392_vm0, %v626_v56, -inf }
 0x332   : > { %v649_v0 = vmax.f32 %v644_v59, %v648_v62 }
 0x334   : > { %v656_v3 = vmax.f32 %v649_v0, %v651_v61 }
 0x335   : > { %v1539_v6 = vpop.f32.mrb[6].mxu1 }
 0x336   : > { %v641_v7 = vadd.f32 %v1539_v6, %v2449_v1  ;;  %v635_v9 = vpop.f32.mrb[7].mxu1 }
 0x337   : > { %v636_v10 = vadd.f32 %v635_v9, %v2452_v4 }
 0x338   : > { %v654_v12 = vsel %vm392_vm0, %v641_v7, -inf }
 0x339   : > { %v655_v15 = vmax.f32 %v647_v11, %v654_v12  ;;  %v652_v16 = vsel %vm392_vm0, %v636_v10, -inf  ;;  %v1558_v17 = vpop.f32.mrb[8].mxu1 }
 0x33a   : > { %v653_v18 = vmax.f32 %v646_v14, %v652_v16  ;;  %v791_v19 = vpop.f32.mrb[9].mxu1 }
 0x33b   : > { %v1783_v20 = vpack.i.bf16 %v1558_v17, %v791_v19 }
 0x33c   : > { %v657_v21 = vmax.f32 %v653_v18, %v655_v15 }
 0x33d   : > { %1784 = vrot.lane.b32.xlu1 %v1783_v20, %s2087_s27 }
 0x33e   : > { %v658_v22 = vmax.f32 %v656_v3, %v657_v21 }
 0x340   : > { %v659_v23 = vrot.slane %v658_v22, 4 }
 0x342   : > { %v660_v24 = vmax.f32 %v658_v22, %v659_v23 }
 0x344   : > { %v661_v25 = vrot.slane %v660_v24, 2 }
 0x346   : > { %v662_v26 = vmax.f32 %v660_v24, %v661_v25 }
 0x348   : > { %v663_v27 = vrot.slane %v662_v26, 1 }
 0x34a   : > { %v664_v28 = vmax.f32 %v662_v26, %v663_v27 }
 0x34c   : > { %v665_v29 = vsub.f32 %v606_v52, %v664_v28  ;;  %v666_v30 = vsub.f32 %v611_v50, %v664_v28  ;;  %v667_v31 = vsub.f32 %v616_v5, %v664_v28  ;;  %v668_v32 = vsub.f32 %v621_v2, %v664_v28 }
 0x34d   : > { %v669_v33 = vsub.f32 %v626_v56, %v664_v28  ;;  %v670_v34 = vsub.f32 %v631_v54, %v664_v28  ;;  %v671_v35 = vsub.f32 %v636_v10, %v664_v28  ;;  %v672_v36 = vsub.f32 %v641_v7, %v664_v28 }
 0x34e   : > { %v673_v37 = vmul.f32 1.442695, %v665_v29  ;;  %v675_v38 = vmul.f32 1.442695, %v666_v30  ;;  %v677_v39 = vmul.f32 1.442695, %v667_v31 }
 0x34f   : > { %v679_v40 = vmul.f32 1.442695, %v668_v32  ;;  %v681_v41 = vmul.f32 1.442695, %v669_v33  ;;  %v683_v43 = vmul.f32 1.442695, %v670_v34 }
 0x350   : > { %1788 = vpow2.f32 %v673_v37  ;;  %v685_v44 = vmul.f32 1.442695, %v671_v35  ;;  %v687_v45 = vmul.f32 1.442695, %v672_v36 }
 0x351   : > { %1790 = vpow2.f32 %v675_v38 }
 0x352   : > { %1792 = vpow2.f32 %v677_v39 }
 0x353   : > { %1794 = vpow2.f32 %v679_v40 }
 0x354   : > { %1796 = vpow2.f32 %v681_v41 }
 0x355   : > { %1798 = vpow2.f32 %v683_v43 }
 0x356   : > { %1800 = vpow2.f32 %v685_v44 }
 0x357   : > { %1802 = vpow2.f32 %v687_v45 }
 0x35a   : > { %v1789_v46 = vpop.eup %1788 }
 0x35b   : > { %v1791_v50 = vpop.eup %1790  ;;  %v689_v52 = vsel %vm392_vm0, %v1789_v46, 0.0 }
 0x35c   : > { %v1793_v53 = vpop.eup %1792  ;;  %v690_v54 = vsel %vm392_vm0, %v1791_v50, 0.0 }
 0x35d   : > { %v1795_v55 = vpop.eup %1794  ;;  %v691_v56 = vadd.f32 %v690_v54, %v689_v52  ;;  %v692_v57 = vsel %vm392_vm0, %v1793_v53, 0.0 }
 0x35e   : > { %v1797_v58 = vpop.eup %1796  ;;  %v694_v61 = vsel %vm392_vm0, %v1795_v55, 0.0 }
 0x35f   : > { %v693_v59 = vadd.f32 %v692_v57, %v691_v56  ;;  %v1799_v62 = vpop.eup %1798  ;;  %v696_v2 = vsel %vm392_vm0, %v1797_v58, 0.0 }
 0x360   : > { %v1801_v3 = vpop.eup %1800  ;;  %v698_v6 = vsel %vm392_vm0, %v1799_v62, 0.0 }
 0x361   : > { %v695_v0 = vadd.f32 %v694_v61, %v693_v59  ;;  %v1803_v7 = vpop.eup %1802  ;;  %v700_v10 = vsel %vm392_vm0, %v1801_v3, 0.0 }
 0x362   : > { %v702_v12 = vsel %vm392_vm0, %v1803_v7, 0.0 }
 0x363   : > { %v697_v5 = vadd.f32 %v696_v2, %v695_v0 }
 0x365   : > { %v699_v9 = vadd.f32 %v698_v6, %v697_v5 }
 0x366   : > { %800 = vxpose.xlu1.b32.start [1/2] (short) (narrow) %v791_v19, 64 }
 0x367   : > { %v701_v11 = vadd.f32 %v700_v10, %v699_v9 }
 0x369   : > { %v703_v14 = vadd.f32 %v702_v12, %v701_v11 }
 0x36a   : > { %801 = vxpose.xlu1.b32.end [2/2] (short) (narrow) %v1558_v17, 64 }
 0x36b   : > { %v704_v15 = vrot.slane %v703_v14, 4 }
 0x36d   : > { %v705_v16 = vadd.f32 %v704_v15, %v703_v14 }
 0x36f   : > { %v706_v18 = vrot.slane %v705_v16, 2 }
 0x371   : > { %v707_v20 = vadd.f32 %v706_v18, %v705_v16 }
 0x373   : > { %v708_v21 = vrot.slane %v707_v20, 1 }
 0x375   : > { %v709_v22 = vadd.f32 %v708_v21, %v707_v20 }
 0x377   : > { %1804 = vrcp.f32 %v709_v22 }
 0x381   : > { %v1805_v23 = vpop.eup %1804 }
 0x382   : > { %v711_v24 = vmul.f32 %v1805_v23, %v1789_v46  ;;  %v712_v25 = vmul.f32 %v1805_v23, %v1791_v50  ;;  %v713_v26 = vmul.f32 %v1805_v23, %v1793_v53  ;;  %v714_v27 = vmul.f32 %v1805_v23, %v1795_v55 }
 0x383   : > { %v715_v28 = vmul.f32 %v1805_v23, %v1797_v58  ;;  %v716_v29 = vmul.f32 %v1805_v23, %v1799_v62  ;;  %v717_v19 = vmul.f32 %v1805_v23, %v1801_v3  ;;  %v718_v30 = vmul.f32 %v1805_v23, %v1803_v7 }
 0x384   : > { %v1669_v31 = vpack.c.bf16 %v712_v25, %v711_v24  ;;  %v1673_v32 = vpack.c.bf16 %v714_v27, %v713_v26 }
 0x385   : > { %v1677_v33 = vpack.c.bf16 %v716_v29, %v715_v28  ;;  %v1681_v17 = vpack.c.bf16 %v718_v30, %v717_v19 }
 0x386   : > { %1670 = vmatprep.subr.bf16.mxu1 %v1669_v31 }
 0x387   : > { %1672 = vmatpush3.bf16.msra.mxu1 %v1669_v31 }
 0x388   : > { %1674 = vmatprep.subr.bf16.mxu1 %v1673_v32 }
 0x38b   : > { %1676 = vmatpush3.bf16.msra.mxu1 %v1673_v32 }
 0x38c   : > { %1678 = vmatprep.subr.bf16.mxu1 %v1677_v33 }
 0x38f   : > { %1680 = vmatpush3.bf16.msra.mxu1 %v1677_v33 }
 0x390   : > { %1682 = vmatprep.subr.bf16.mxu1 %v1681_v17 }
 0x393   : > { %1684 = vmatpush3.bf16.msra.mxu1 %v1681_v17 }
 0x396   : > { %1611 = vmatmul.mubr.msk.f32.vlgmr.msra.gmra.mrb[10].mxu1 %vm392_vm0, %v2424_v42 }
 0x3af   : > { %v1785_v34 = vpop.permute.xlu1 %1784 }
 0x3b0   : > { %v1787_v35 = vunpack.i.h.bf16 %v1785_v34  ;;  %v1786_v36 = vunpack.i.l.bf16 %v1785_v34 }
 0x3b2   : > { %v1649_v37 = vpack.c.bf16 %v1787_v35, %v1786_v36 }
 0x3b4   : > { %1650 = vmatprep.subr.bf16.mxu0 %v1649_v37 }
 0x3b5   : > { %1652 = vmatpush3.bf16.msra.mxu0 %v1649_v37 }
 0x3e6   : > { %v816_v38 = vpop.trf.xlu1 }
 0x3e7   : > { %1563 = vmatprep.mubr.msk.f32.mxu0 %vm514_vm1, %v816_v38 }
 0x3ea   : > { %v817_v39 = vpop.trf.xlu1 }
 0x3eb   : > { %1564 = vmatmul.mubr.msk.f32.vlgmr.msra.gmra.mrb[2].mxu0 %vm514_vm1, %v817_v39 }
 0x3ee   : > { %v818_v40 = vpop.trf.xlu1 }
 0x3ef   : > { %1566 = vmatprep.mubr.msk.f32.mxu0 %vm514_vm1, %v818_v40 }
 0x3f2   : > { %v819_v41 = vpop.trf.xlu1 }
 0x3f3   : > { %1567 = vmatmul.mubr.msk.f32.gmra.mrb[4].mxu0 %vm514_vm1, %v819_v41 }
 0x3f6   : > { %v820_v43 = vpop.trf.xlu1 }
 0x3f7   : > { %1569 = vmatprep.mubr.msk.f32.mxu0 %vm514_vm1, %v820_v43 }
 0x3fa   : > { %v821_v42 = vpop.trf.xlu1 }
 0x3fb   : > { %1570 = vmatmul.mubr.msk.f32.gmra.mrb[6].mxu0 %vm514_vm1, %v821_v42 }
 0x3fe   : > { %v822_v44 = vpop.trf.xlu1 }
 0x3ff   : > { %1572 = vmatprep.mubr.msk.f32.mxu0 %vm514_vm1, %v822_v44 }
 0x402   : > { %v823_v45 = vpop.trf.xlu1 }
 0x403   : > { %1573 = vmatmul.mubr.msk.f32.gmra.mrb[8].mxu0 %vm514_vm1, %v823_v45 }
 0x404   : > { %1591 = vmatprep.mubr.msk.f32.mxu0 %vm392_vm0, %v2400_v8 }
 0x4be   : > { %v1565_v46 = vpop.f32.mrb[2].mxu0 }
 0x4bf   : > { %v930_v50 = vpop.f32.mrb[3].mxu0  ;;  %v936_v54 = vadd.f32 %v1565_v46, %v2429_v47 }
 0x4c0   : > { %v931_v55 = vadd.f32 %v930_v50, %v2431_v48 }
 0x4c1   : > { %v970_v61 = vsel %vm392_vm0, %v936_v54, -inf }
 0x4c2   : > { %v969_v8 = vsel %vm392_vm0, %v931_v55, -inf }
 0x4c6   : > { %v1568_v52 = vpop.f32.mrb[4].mxu0 }
 0x4c7   : > { %v940_v53 = vpop.f32.mrb[5].mxu0  ;;  %v946_v47 = vadd.f32 %v1568_v52, %v2444_v60 }
 0x4c8   : > { %v941_v48 = vadd.f32 %v940_v53, %v2447_v63 }
 0x4c9   : > { %v972_v9 = vsel %vm392_vm0, %v946_v47, -inf }
 0x4ca   : > { %v971_v11 = vsel %vm392_vm0, %v941_v48, -inf }
 0x4ce   : > { %v1571_v56 = vpop.f32.mrb[6].mxu0 }
 0x4cf   : > { %v956_v57 = vadd.f32 %v1571_v56, %v2433_v49  ;;  %v950_v58 = vpop.f32.mrb[7].mxu0 }
 0x4d0   : > { %v951_v59 = vadd.f32 %v950_v58, %v2436_v51 }
 0x4d1   : > { %v975_v62 = vsel %vm392_vm0, %v956_v57, -inf }
 0x4d2   : > { %v976_v0 = vmax.f32 %v970_v61, %v975_v62  ;;  %v973_v2 = vsel %vm392_vm0, %v951_v59, -inf }
 0x4d3   : > { %v974_v3 = vmax.f32 %v969_v8, %v973_v2 }
 0x4d5   : > { %v981_v5 = vmax.f32 %v974_v3, %v976_v0 }
 0x4d6   : > { %v1574_v6 = vpop.f32.mrb[8].mxu0 }
 0x4d7   : > { %v966_v49 = vadd.f32 %v1574_v6, %v2449_v1  ;;  %v960_v7 = vpop.f32.mrb[9].mxu0 }
 0x4d8   : > { %v961_v51 = vadd.f32 %v960_v7, %v2452_v4 }
 0x4d9   : > { %v979_v10 = vsel %vm392_vm0, %v966_v49, -inf }
 0x4da   : > { %v980_v12 = vmax.f32 %v972_v9, %v979_v10  ;;  %v977_v14 = vsel %vm392_vm0, %v961_v51, -inf }
 0x4db   : > { %v978_v15 = vmax.f32 %v971_v11, %v977_v14 }
 0x4dd   : > { %v982_v60 = vmax.f32 %v978_v15, %v980_v12 }
 0x4df   : > { %v983_v16 = vmax.f32 %v981_v5, %v982_v60 }
 0x4e1   : > { %v984_v18 = vrot.slane %v983_v16, 4 }
 0x4e3   : > { %v985_v63 = vmax.f32 %v983_v16, %v984_v18 }
 0x4e5   : > { %v986_v20 = vrot.slane %v985_v63, 2 }
 0x4e7   : > { %v987_v21 = vmax.f32 %v985_v63, %v986_v20  ;;  %v1612_v63 = vpop.f32.mrb[10].mxu1 }
 0x4e8   : > { %1197 = vst.msk [vmem:[%s363_s4 + $0x8] sm:$0xff] %vm392_vm0, %v1612_v63  ;;  %v1187_v20 = vpop.f32.mrb[11].mxu1 }
 0x4e9   : > { %v988_v1 = vrot.slane %v987_v21, 1  ;;  %1196 = vst.msk [vmem:[%s363_s4] sm:$0xff] %vm392_vm0, %v1187_v20 }
 0x4eb   : > { %v989_v22 = vmax.f32 %v987_v21, %v988_v1 }
 0x4ed   : > { %v990_v23 = vsub.f32 %v931_v55, %v989_v22  ;;  %v991_v4 = vsub.f32 %v936_v54, %v989_v22  ;;  %v992_v24 = vsub.f32 %v941_v48, %v989_v22  ;;  %v993_v25 = vsub.f32 %v946_v47, %v989_v22 }
 0x4ee   : > { %v994_v26 = vsub.f32 %v951_v59, %v989_v22  ;;  %v995_v27 = vsub.f32 %v956_v57, %v989_v22  ;;  %v996_v28 = vsub.f32 %v961_v51, %v989_v22  ;;  %v997_v29 = vsub.f32 %v966_v49, %v989_v22 }
 0x4ef   : > { %v998_v19 = vmul.f32 1.442695, %v990_v23  ;;  %v1000_v30 = vmul.f32 1.442695, %v991_v4  ;;  %v1002_v31 = vmul.f32 1.442695, %v992_v24 }
 0x4f0   : > { %v1004_v32 = vmul.f32 1.442695, %v993_v25  ;;  %v1006_v33 = vmul.f32 1.442695, %v994_v26  ;;  %v1008_v17 = vmul.f32 1.442695, %v995_v27 }
 0x4f1   : > { %1806 = vpow2.f32 %v998_v19  ;;  %v1010_v34 = vmul.f32 1.442695, %v996_v28  ;;  %v1012_v35 = vmul.f32 1.442695, %v997_v29 }
 0x4f2   : > { %1808 = vpow2.f32 %v1000_v30 }
 0x4f3   : > { %1810 = vpow2.f32 %v1002_v31 }
 0x4f4   : > { %1812 = vpow2.f32 %v1004_v32 }
 0x4f5   : > { %1814 = vpow2.f32 %v1006_v33 }
 0x4f6   : > { %1816 = vpow2.f32 %v1008_v17 }
 0x4f7   : > { %1818 = vpow2.f32 %v1010_v34 }
 0x4f8   : > { %1820 = vpow2.f32 %v1012_v35 }
 0x4fb   : > { %v1807_v36 = vpop.eup %1806 }
 0x4fc   : > { %v1809_v37 = vpop.eup %1808  ;;  %v1014_v38 = vsel %vm392_vm0, %v1807_v36, 0.0 }
 0x4fd   : > { %v1811_v39 = vpop.eup %1810  ;;  %v1015_v40 = vsel %vm392_vm0, %v1809_v37, 0.0 }
 0x4fe   : > { %v1813_v41 = vpop.eup %1812  ;;  %v1016_v43 = vadd.f32 %v1015_v40, %v1014_v38  ;;  %v1017_v42 = vsel %vm392_vm0, %v1811_v39, 0.0 }
 0x4ff   : > { %v1815_v44 = vpop.eup %1814  ;;  %v1019_v46 = vsel %vm392_vm0, %v1813_v41, 0.0 }
 0x500   : > { %v1018_v45 = vadd.f32 %v1017_v42, %v1016_v43  ;;  %v1817_v50 = vpop.eup %1816  ;;  %v1021_v53 = vsel %vm392_vm0, %v1815_v44, 0.0 }
 0x501   : > { %v1819_v54 = vpop.eup %1818  ;;  %v1023_v56 = vsel %vm392_vm0, %v1817_v50, 0.0 }
 0x502   : > { %v1020_v52 = vadd.f32 %v1019_v46, %v1018_v45  ;;  %v1821_v57 = vpop.eup %1820  ;;  %v1025_v59 = vsel %vm392_vm0, %v1819_v54, 0.0 }
 0x503   : > { %v1027_v62 = vsel %vm392_vm0, %v1821_v57, 0.0 }
 0x504   : > { %v1022_v55 = vadd.f32 %v1021_v53, %v1020_v52 }
 0x506   : > { %v1024_v58 = vadd.f32 %v1023_v56, %v1022_v55 }
 0x508   : > { %v1026_v61 = vadd.f32 %v1025_v59, %v1024_v58 }
 0x50a   : > { %v1028_v8 = vadd.f32 %v1027_v62, %v1026_v61 }
 0x50c   : > { %v1029_v0 = vrot.slane %v1028_v8, 4 }
 0x50e   : > { %v1030_v2 = vadd.f32 %v1029_v0, %v1028_v8 }
 0x510   : > { %v1031_v3 = vrot.slane %v1030_v2, 2 }
 0x512   : > { %v1032_v47 = vadd.f32 %v1031_v3, %v1030_v2 }
 0x514   : > { %v1033_v5 = vrot.slane %v1032_v47, 1 }
 0x516   : > { %v1034_v48 = vadd.f32 %v1033_v5, %v1032_v47 }
 0x518   : > { %1822 = vrcp.f32 %v1034_v48 }
 0x522   : > { %v1823_v6 = vpop.eup %1822 }
 0x523   : > { %v1036_v49 = vmul.f32 %v1823_v6, %v1807_v36  ;;  %v1037_v7 = vmul.f32 %v1823_v6, %v1809_v37  ;;  %v1038_v51 = vmul.f32 %v1823_v6, %v1811_v39  ;;  %v1039_v9 = vmul.f32 %v1823_v6, %v1813_v41 }
 0x524   : > { %v1040_v10 = vmul.f32 %v1823_v6, %v1815_v44  ;;  %v1041_v11 = vmul.f32 %v1823_v6, %v1817_v50  ;;  %v1042_v12 = vmul.f32 %v1823_v6, %v1819_v54  ;;  %v1043_v14 = vmul.f32 %v1823_v6, %v1821_v57 }
 0x525   : > { %v1653_v15 = vpack.c.bf16 %v1037_v7, %v1036_v49  ;;  %v1657_v60 = vpack.c.bf16 %v1039_v9, %v1038_v51 }
 0x526   : > { %v1661_v16 = vpack.c.bf16 %v1041_v11, %v1040_v10  ;;  %v1665_v18 = vpack.c.bf16 %v1043_v14, %v1042_v12 }
 0x527   : > { %1654 = vmatprep.subr.bf16.mxu0 %v1653_v15 }
 0x528   : > { %1656 = vmatpush3.bf16.msra.mxu0 %v1653_v15 }
 0x529   : > { %1658 = vmatprep.subr.bf16.mxu0 %v1657_v60 }
 0x52c   : > { %1660 = vmatpush3.bf16.msra.mxu0 %v1657_v60 }
 0x52d   : > { %1662 = vmatprep.subr.bf16.mxu0 %v1661_v16 }
 0x530   : > { %1664 = vmatpush3.bf16.msra.mxu0 %v1661_v16 }
 0x531   : > { %1666 = vmatprep.subr.bf16.mxu0 %v1665_v18 }
 0x534   : > { %1668 = vmatpush3.bf16.msra.mxu0 %v1665_v18 }
 0x537   : > { %1592 = vmatmul.mubr.msk.f32.vlgmr.msra.gmra.mrb[10].mxu0 %vm392_vm0, %v2406_v13 }
 0x538   : > { %1981 = shalt.err (!%p1978_p3)
}
 0x539   : > { %s1982_s0 = scalar_lea.hbm %s2519_s9, 256  ;;  %s1986_s29 = scalar_lea.hbm %s2611_s6, 512 }
 0x53a   : > { %p1983_p9 = scmp.ne.s32.totalorder %s2519_s9, %s1982_s0  ;;  %p1987_p7 = scmp.lt.u32.totalorder %s2519_s9, %s2611_s6 }
 0x53b   : > { %p1988_p12 = scmp.lt.u32.totalorder %s1986_s29, %s1982_s0  ;;  %p1990_p2 = scmp.lt.u32.totalorder %s1982_s0, %s2519_s9 }
 0x53c   : > { %p1984_p13 = pnand %p1983_p9, %p2281_p5 }
 0x53d   : > { %p1989_p1 = por %p1988_p12, %p1987_p7 }
 0x53e   : > { %p1985_p11 = pneg %p1984_p13 }
 0x53f   : > { %p1991_p4 = por %p1990_p2, %p1989_p1 }
 0x541   : > { %p1992_p0 = pnand %p1991_p4, %p1985_p11 }
 0x543   : > { %1995 = shalt.err (!%p1992_p0)
}
 0x544   : > { %s2089_s27 = smov 128   ;;  %s2090_s4 = smov 8  }
 0x545   : > { %1702 = dma.vmem_to_hbm [thread:$0]  (%p2281_p5), %s2510_s8, 256, %s2519_s9, %s1204_s17, %s2089_s27, %s2089_s27, %s2090_s4  }
 0x546   : > { %s356_s7 = scalar_lea.vmem [#allocation11], %s2376_s20  ;;  %s2556_s26 = scalar_lea.hbm %s2610_s5, %s1443_s13 }
 0x547   : > { %s1217_s16 = sshll.u32 %s356_s7, 4  ;;  %s1199_s8 = scalar_lea.sflag [#allocation4], %s2373_s14  ;;  %s2549_s16 = int_to_ptr.vmem [resolvable:$true] %s1217_s16 }
 0x548   : > { %s1996_s20 = scalar_lea.vmem %s2549_s16, 256  ;;  %s2091_s9 = smov [#allocation11]  }
 0x549   : > { %p1997_p8 = scmp.ne.s32.totalorder %s2549_s16, %s1996_s20  ;;  %s2000_s17 = sshll.u32 %s2091_s9, 4  ;;  %s2001_s17 = int_to_ptr.vmem [resolvable:$false] %s2000_s17 }
 0x54a   : > { %s2002_s25 = scalar_lea.vmem %s2001_s17, 512  ;;  %p2003_p3 = scmp.lt.s32.totalorder %s2549_s16, %s2001_s17 }
 0x54b   : > { %p1998_p6 = pnand %p1997_p8, %p2281_p5  ;;  %p2004_p9 = scmp.lt.s32.totalorder %s2002_s25, %s1996_s20 }
 0x54d   : > { %p1999_p10 = pneg %p1998_p6  ;;  %p2005_p13 = por %p2004_p9, %p2003_p3 }
 0x54f   : > { %p2006_p11 = pnand %p2005_p13, %p1999_p10 }
 0x60a   : > { %v1593_v13 = vpop.f32.mrb[10].mxu0 }
 0x60b   : > { %1120 = vst.msk [vmem:[%s356_s7 + $0x8] sm:$0xff] %vm392_vm0, %v1593_v13  ;;  %v1110_v21 = vpop.f32.mrb[11].mxu0 }
 0x60c   : > { %1119 = vst.msk [vmem:[%s356_s7] sm:$0xff] %vm392_vm0, %v1110_v21 }
 0x60d   : > { %2009 = shalt.err (!%p2006_p11)
}
 0x60e   : > { %s2010_s13 = scalar_lea.hbm %s2556_s26, 256  ;;  %s2014_s11 = scalar_lea.hbm %s2610_s5, 512 }
 0x60f   : > { %p2011_p7 = scmp.ne.s32.totalorder %s2556_s26, %s2010_s13  ;;  %p2015_p2 = scmp.lt.u32.totalorder %s2556_s26, %s2610_s5 }
 0x610   : > { %p2016_p4 = scmp.lt.u32.totalorder %s2014_s11, %s2010_s13  ;;  %p2018_p8 = scmp.lt.u32.totalorder %s2010_s13, %s2556_s26 }
 0x611   : > { %p2012_p12 = pnand %p2011_p7, %p2281_p5 }
 0x612   : > { %p2017_p0 = por %p2016_p4, %p2015_p2 }
 0x613   : > { %p2013_p1 = pneg %p2012_p12 }
 0x614   : > { %p2019_p6 = por %p2018_p8, %p2017_p0 }
 0x616   : > { %p2020_p10 = pnand %p2019_p6, %p2013_p1 }
 0x618   : > { %2023 = shalt.err (!%p2020_p10)
}
 0x619   : > { %1701 = dma.vmem_to_hbm [thread:$0]  (%p2281_p5), %s2549_s16, 256, %s2556_s26, %s1199_s8, %s2089_s27, %s2089_s27, %s2090_s4  }
 0x61a PF: > { %s1248_s19 = sand.u32 1, %s2066_s21   ;;  %p2644_p3 = scmp.ne.s32.totalorder %s2624_s28, 0 }
 0x61b   : > { %p2645_p9 = scmp.ge.s32.totalorder %s2078_s24, 2  ;;  %s1249_s2 = scalar_lea.sflag [#allocation4], %s1248_s19 }
 0x61d   : > { %p1723_p13 = pnand %p2645_p9, %p2644_p3 }
 0x61f   : > { %2057 = dma.done.wait (!%p1723_p13), %s1249_s2, 256  }
 0x620   : > { %2059 = vsyncadd (!%p1723_p13), %s1249_s2, 4294967040  ;;  %s1258_s15 = scalar_lea.sflag [#allocation13], %s1248_s19 }
 0x621   : > { %2061 = dma.done.wait (!%p1723_p13), %s1258_s15, 256  }
 0x622   : > { %2063 = vsyncadd (!%p1723_p13), %s1258_s15, 4294967040  ;;  %s2646_s14 = sld [smem:[#allocation20_spill]]  ;;  %p27_p5 = scmp.ge.s32.totalorder %s2267_s18, 4  }
 0x623   : > { %s2647_s21 = smov %s2070_s22  ;;  %s2648_s22 = smov %s2074_s23 }
 0x624   : > { %s2650_s24 = smov %s2267_s18  ;;  %29 = sbr.rel (!%p27_p5) target bundleno = 15 (0xf), region = 127 }
 0x628   : > { %s2649_s23 = smov %s2646_s14 }
 0x62b   :  { %1263 = vsyncpa [#allocation3], 1 }
 0x62c   :  { %1265 = vsyncpa [#allocation3 + $0x1], 1 }
 0x62d   :  { %1266 = vsyncpa [#allocation6], 1 }
 0x62e   :  { %1268 = vsyncpa [#allocation6 + $0x1], 1 }
 0x62f   :  { %1269 = vsyncpa [#allocation9], 1 }
 0x630   :  { %1270 = vsyncpa [#allocation4], 1 }
 0x631   :  { %1272 = vsyncpa [#allocation4 + $0x1], 1 }
 0x632   :  { %1273 = vsyncpa [#allocation13], 1 }
 0x633   :  { %1275 = vsyncpa [#allocation13 + $0x1], 1 }

</bundles_post_ra>
